<compile_context>
chip_gen: v6e
topology: v6e:2x2x1
jax: 0.10.0
libtpu: 0.0.40
codegen_flags: <defaults>
</compile_context>

<pallas_src>
import numpy as np
import jax
import jax.numpy as jnp
from jax import lax
from jax.experimental import pallas as pl
from jax.experimental.pallas import tpu as pltpu

B = 2              # batch
H_IN = W_IN = 32   # spatial input (so fc1 sees 6*5*5 features)
C1, C2 = 3, 6
K = 5
LANES = 128        # per-ki output slab width (even + odd column halves)
HALF = 64          # one even/odd half inside a slab


# --------------------------------------------------------------------------
# Kernel: whole batch, one grid step.  6 MXU pushes total, everything else
# lands in VPU/XLU slots that are idle under the MXU latency chain.
# --------------------------------------------------------------------------
def cnn_kernel(x_ref, w1_ref, w2_ref, misc_ref, out_ref):
    f32, bf16 = jnp.float32, jnp.bfloat16
    dot = lambda a, b: jnp.dot(a, b, preferred_element_type=f32)

    m = misc_ref[...]                       # (8,128) f32 constants
    b1row = m[0:1, :]                       # conv1 bias, lane layout e*64+co*14+j
    b2row = m[1:2, :]                       # conv2 bias, lane layout e*64+co*5+j
    fcb = m[2:3, 0:1]                       # fc bias
    fcw = m[3:8, 0:HALF]                    # fc weights, (5,64) pooled-lane layout

    # ---- conv1 (1->3, k=5): one Toeplitz matmul, 5 shifted-slab adds ---------
    x = x_ref[...]                          # (64,32) bf16, images stacked in M
    y1 = dot(x, w1_ref[...])                # (64, 640) f32
    acc1 = y1[0:60, 0:LANES]
    for ki in range(1, K):
        acc1 = acc1 + y1[ki:ki + 60, ki * LANES:(ki + 1) * LANES]
    # rows 0..27 image0, 28..31 junk (never selected), 32..59 image1
    act1 = jnp.maximum(acc1 + b1row, 0.0).astype(bf16)        # (60,128)

    # ---- maxpool1: rows via in-kernel one-hot selectors, cols via lane halves
    r_i = lax.broadcasted_iota(jnp.int32, (28, 60), 0)
    c_i = lax.broadcasted_iota(jnp.int32, (28, 60), 1)
    tgt = 2 * r_i + jnp.where(r_i >= 14, 4, 0)                # skip 4 junk rows
    sel_e = jnp.where(c_i == tgt, 1.0, 0.0).astype(bf16)
    sel_o = jnp.where(c_i == tgt + 1, 1.0, 0.0).astype(bf16)
    r1 = jnp.maximum(dot(sel_e, act1), dot(sel_o, act1))      # (28,128)
    h1 = jnp.maximum(r1[:, 0:HALF], r1[:, HALF:LANES]).astype(bf16)   # (28,64)

    # ---- conv2 (3->6, k=5): one Toeplitz matmul, 5 shifted-slab adds ---------
    y2 = dot(h1, w2_ref[...])               # (28, 640) f32
    acc2 = y2[0:24, 0:LANES]
    for ki in range(1, K):
        acc2 = acc2 + y2[ki:ki + 24, ki * LANES:(ki + 1) * LANES]
    # rows 0..9 image0, 10..13 junk, 14..23 image1
    act2 = jnp.maximum(acc2 + b2row, 0.0).astype(bf16)        # (24,128)

    # ---- maxpool2 ------------------------------------------------------------
    r_i2 = lax.broadcasted_iota(jnp.int32, (10, 24), 0)
    c_i2 = lax.broadcasted_iota(jnp.int32, (10, 24), 1)
    tgt2 = 2 * r_i2 + jnp.where(r_i2 >= 5, 4, 0)
    sel2_e = jnp.where(c_i2 == tgt2, 1.0, 0.0).astype(bf16)
    sel2_o = jnp.where(c_i2 == tgt2 + 1, 1.0, 0.0).astype(bf16)
    r2 = jnp.maximum(dot(sel2_e, act2), dot(sel2_o, act2))    # (10,128)
    p2 = jnp.maximum(r2[:, 0:HALF], r2[:, HALF:LANES])        # (10,64) f32

    # ---- fc1 (150 -> 1): elementwise mul with rearranged weights + reduce ----
    red0 = jnp.sum(jnp.sum(p2[0:5, :] * fcw, axis=1, keepdims=True),
                   axis=0, keepdims=True) + fcb               # image 0, (1,1)
    red1 = jnp.sum(jnp.sum(p2[5:10, :] * fcw, axis=1, keepdims=True),
                   axis=0, keepdims=True) + fcb               # image 1, (1,1)

    rows = lax.broadcasted_iota(jnp.int32, (8, 128), 0)
    cols = lax.broadcasted_iota(jnp.int32, (8, 128), 1)
    out = jnp.where((rows == 0) & (cols == 0), red0,
                    jnp.where((rows == 1) & (cols == 0), red1, 0.0))
    out_ref[...] = out                      # single unmasked lane-dense store


# --------------------------------------------------------------------------
# Wrapper-side weight-layout construction (layout plumbing only, tiny sizes).
# --------------------------------------------------------------------------
def _build_w1_slab(w1):
    # (C1,1,5,5) -> (32, 5*128): slab ki holds conv1 outputs, even cols in
    # lanes [0,64), odd cols in [64,128); within-half lane = co*14 + j'.
    w1 = np.asarray(w1, np.float32)
    slab = np.zeros((W_IN, K * LANES), np.float32)
    for ki in range(K):
        for e in range(2):
            for co in range(C1):
                for jp in range(14):
                    col = ki * LANES + e * HALF + co * 14 + jp
                    for kj in range(K):
                        slab[2 * jp + e + kj, col] = w1[co, 0, ki, kj]
    return jnp.asarray(slab, jnp.bfloat16)


def _build_w2_slab(w2):
    # (C2,C1,5,5) -> (64, 5*128): rows indexed by pooled-layer lane ci*14 + c,
    # columns ki*128 + e*64 + co*5 + j'.
    w2 = np.asarray(w2, np.float32)
    slab = np.zeros((HALF, K * LANES), np.float32)
    for ki in range(K):
        for e in range(2):
            for co in range(C2):
                for jp in range(5):
                    col = ki * LANES + e * HALF + co * 5 + jp
                    for ci in range(C1):
                        for kj in range(K):
                            slab[ci * 14 + 2 * jp + e + kj, col] = w2[co, ci, ki, kj]
    return jnp.asarray(slab, jnp.bfloat16)


def _build_misc(b1, b2, fw, fb):
    # One (8,128) f32 slab: row0 conv1 bias, row1 conv2 bias, row2[0] fc bias,
    # rows 3..7 fc weights rearranged to the pooled (row, co*5+col) lane layout.
    b1 = np.asarray(b1, np.float32)
    b2 = np.asarray(b2, np.float32)
    fw = np.asarray(fw, np.float32)
    fb = np.asarray(fb, np.float32)
    m = np.zeros((8, 128), np.float32)
    for e in range(2):
        for co in range(C1):
            m[0, e * HALF + co * 14: e * HALF + co * 14 + 14] = b1[co]
        for co in range(C2):
            m[1, e * HALF + co * 5: e * HALF + co * 5 + 5] = b2[co]
    m[2, 0] = fb[0]
    for p in range(5):
        for co in range(C2):
            for j in range(5):
                m[3 + p, co * 5 + j] = fw[0, co * 25 + p * 5 + j]
    return jnp.asarray(m)


def cnn_forward(x, w1, b1, w2, b2, fw, fb):
    assert x.shape == (B, 1, H_IN, W_IN)
    x2d = jnp.asarray(x, jnp.float32).reshape(B * H_IN, W_IN).astype(jnp.bfloat16)
    w1s = _build_w1_slab(w1)      # (32, 640) bf16
    w2s = _build_w2_slab(w2)      # (64, 640) bf16
    misc = _build_misc(b1, b2, fw, fb)   # (8, 128) f32

    out = pl.pallas_call(
        cnn_kernel,
        out_shape=jax.ShapeDtypeStruct((8, 128), jnp.float32),
        grid=(1,),
        in_specs=[
            pl.BlockSpec((B * H_IN, W_IN), lambda i: (0, 0)),
            pl.BlockSpec((W_IN, K * LANES), lambda i: (0, 0)),
            pl.BlockSpec((HALF, K * LANES), lambda i: (0, 0)),
            pl.BlockSpec((8, 128), lambda i: (0, 0)),
        ],
        out_specs=pl.BlockSpec((8, 128), lambda i: (0, 0)),
        compiler_params=pltpu.CompilerParams(
            dimension_semantics=("arbitrary",)),
    )(x2d, w1s, w2s, misc)

    return out[0:B, 0:1]                                      # (B, 1)


# --------------------------------------------------------------------------
# Pure-JAX reference + deterministic init
# --------------------------------------------------------------------------
def reference_forward(x, w1, b1, w2, b2, fw, fb):
    dn = ("NCHW", "OIHW", "NCHW")
    y = lax.conv_general_dilated(x, w1, (1, 1), "VALID", dimension_numbers=dn)
    y = jnp.maximum(y + b1[None, :, None, None], 0.0)
    y = lax.reduce_window(y, -jnp.inf, lax.max, (1, 1, 2, 2), (1, 1, 2, 2), "VALID")
    y = lax.conv_general_dilated(y, w2, (1, 1), "VALID", dimension_numbers=dn)
    y = jnp.maximum(y + b2[None, :, None, None], 0.0)
    y = lax.reduce_window(y, -jnp.inf, lax.max, (1, 1, 2, 2), (1, 1, 2, 2), "VALID")
    y = y.reshape(y.shape[0], -1)
    return y @ fw.T + fb


def init_params(key):
    # PyTorch-default-style init: U(-1/sqrt(fan_in), +1/sqrt(fan_in))
    k1, k2, k3, k4, k5, k6 = jax.random.split(key, 6)

    def u(k, shape, fan_in):
        bound = 1.0 / float(np.sqrt(fan_in))
        return jax.random.uniform(k, shape, jnp.float32, -bound, bound)

    w1 = u(k1, (C1, 1, K, K), 1 * K * K)
    b1 = u(k2, (C1,), 1 * K * K)
    w2 = u(k3, (C2, C1, K, K), C1 * K * K)
    b2 = u(k4, (C2,), C1 * K * K)
    fw = u(k5, (1, C2 * 5 * 5), C2 * 5 * 5)
    fb = u(k6, (1,), C2 * 5 * 5)
    return w1, b1, w2, b2, fw, fb


if __name__ == "__main__":
    key = jax.random.PRNGKey(0)
    kx, kp = jax.random.split(key)
    x = jax.random.normal(kx, (B, 1, H_IN, W_IN), dtype=jnp.float32)
    params = init_params(kp)

    out = cnn_forward(x, *params)
    out = jax.block_until_ready(out)

    ref = jax.block_until_ready(reference_forward(x, *params))
    assert out.shape == (B, 1)
    np.testing.assert_allclose(np.asarray(out), np.asarray(ref), rtol=2e-2, atol=2e-2)
    print("KERNEL_OK")
</pallas_src>

<mosaic_0001>
module attributes {stable_mosaic.version = 11 : i64} {
  func.func @cnn_kernel(%arg0: i32, %arg1: memref<64x32xbf16, #tpu.memory_space<vmem>>, %arg2: memref<32x640xbf16, #tpu.memory_space<vmem>>, %arg3: memref<64x640xbf16, #tpu.memory_space<vmem>>, %arg4: memref<8x128xf32, #tpu.memory_space<vmem>>, %arg5: memref<8x128xf32, #tpu.memory_space<vmem>>) attributes {dimension_semantics = [#tpu.dimension_semantics<arbitrary>], iteration_bounds = array<i64: 1>, scalar_prefetch = 0 : i64, scratch_operands = 0 : i64, tpu.core_type = #tpu.core_type<tc>, window_params = [{pipeline_mode = #tpu.pipeline_mode<synchronous>, transform_indices = @transform_0, window_bounds = array<i64: 64, 32>}, {pipeline_mode = #tpu.pipeline_mode<synchronous>, transform_indices = @transform_1, window_bounds = array<i64: 32, 640>}, {pipeline_mode = #tpu.pipeline_mode<synchronous>, transform_indices = @transform_2, window_bounds = array<i64: 64, 640>}, {pipeline_mode = #tpu.pipeline_mode<synchronous>, transform_indices = @transform_3, window_bounds = array<i64: 8, 128>}, {pipeline_mode = #tpu.pipeline_mode<synchronous>, transform_indices = @transform_4, window_bounds = array<i64: 8, 128>}]} {
    %c0 = arith.constant 0 : index
    %c0_0 = arith.constant 0 : index
    %0 = vector.load %arg4[%c0, %c0_0] : memref<8x128xf32, #tpu.memory_space<vmem>>, vector<8x128xf32>
    %1 = vector.extract_strided_slice %0 {offsets = [0, 0], sizes = [1, 128], strides = [1, 1]} : vector<8x128xf32> to vector<1x128xf32>
    %2 = vector.extract_strided_slice %0 {offsets = [1, 0], sizes = [1, 128], strides = [1, 1]} : vector<8x128xf32> to vector<1x128xf32>
    %3 = vector.extract_strided_slice %0 {offsets = [2, 0], sizes = [1, 1], strides = [1, 1]} : vector<8x128xf32> to vector<1x1xf32>
    %4 = vector.extract_strided_slice %0 {offsets = [3, 0], sizes = [5, 64], strides = [1, 1]} : vector<8x128xf32> to vector<5x64xf32>
    %c0_1 = arith.constant 0 : index
    %c0_2 = arith.constant 0 : index
    %5 = vector.load %arg1[%c0_1, %c0_2] : memref<64x32xbf16, #tpu.memory_space<vmem>>, vector<64x32xbf16>
    %c0_3 = arith.constant 0 : index
    %c0_4 = arith.constant 0 : index
    %6 = vector.load %arg2[%c0_3, %c0_4] : memref<32x640xbf16, #tpu.memory_space<vmem>>, vector<32x640xbf16>
    %cst = arith.constant dense<0.000000e+00> : vector<64x640xf32>
    %7 = tpu.matmul %5, %6, %cst {dimension_numbers = #tpu.dot_dimension_numbers<[1], [0], [0], [1], [0, 0, 1, 1], [], []>} : vector<64x32xbf16>, vector<32x640xbf16>, vector<64x640xf32> -> vector<64x640xf32>
    %8 = vector.extract_strided_slice %7 {offsets = [0, 0], sizes = [60, 128], strides = [1, 1]} : vector<64x640xf32> to vector<60x128xf32>
    %9 = vector.extract_strided_slice %7 {offsets = [1, 128], sizes = [60, 128], strides = [1, 1]} : vector<64x640xf32> to vector<60x128xf32>
    %10 = arith.addf %8, %9 : vector<60x128xf32>
    %11 = vector.extract_strided_slice %7 {offsets = [2, 256], sizes = [60, 128], strides = [1, 1]} : vector<64x640xf32> to vector<60x128xf32>
    %12 = arith.addf %10, %11 : vector<60x128xf32>
    %13 = vector.extract_strided_slice %7 {offsets = [3, 384], sizes = [60, 128], strides = [1, 1]} : vector<64x640xf32> to vector<60x128xf32>
    %14 = arith.addf %12, %13 : vector<60x128xf32>
    %15 = vector.extract_strided_slice %7 {offsets = [4, 512], sizes = [60, 128], strides = [1, 1]} : vector<64x640xf32> to vector<60x128xf32>
    %16 = arith.addf %14, %15 : vector<60x128xf32>
    %17 = vector.broadcast %1 : vector<1x128xf32> to vector<60x128xf32>
    %18 = arith.addf %16, %17 : vector<60x128xf32>
    %cst_5 = arith.constant 0.000000e+00 : f32
    %19 = vector.broadcast %cst_5 : f32 to vector<60x128xf32>
    %20 = arith.maximumf %18, %19 : vector<60x128xf32>
    %21 = arith.truncf %20 : vector<60x128xf32> to vector<60x128xbf16>
    %22 = tpu.iota {dimensions = array<i32: 0>} : vector<28x60xi32>
    %23 = tpu.iota {dimensions = array<i32: 1>} : vector<28x60xi32>
    %c2_i32 = arith.constant 2 : i32
    %24 = vector.broadcast %c2_i32 : i32 to vector<28x60xi32>
    %25 = arith.muli %24, %22 : vector<28x60xi32>
    %c14_i32 = arith.constant 14 : i32
    %26 = vector.broadcast %c14_i32 : i32 to vector<28x60xi32>
    %27 = arith.cmpi sge, %22, %26 : vector<28x60xi32>
    %c4_i32 = arith.constant 4 : i32
    %c0_i32 = arith.constant 0 : i32
    %28 = vector.broadcast %c4_i32 : i32 to vector<28x60xi32>
    %29 = vector.broadcast %c0_i32 : i32 to vector<28x60xi32>
    %30 = arith.select %27, %28, %29 : vector<28x60xi1>, vector<28x60xi32>
    %31 = arith.addi %25, %30 : vector<28x60xi32>
    %32 = arith.cmpi eq, %23, %31 : vector<28x60xi32>
    %cst_6 = arith.constant 1.000000e+00 : f32
    %cst_7 = arith.constant 0.000000e+00 : f32
    %33 = vector.broadcast %cst_6 : f32 to vector<28x60xf32>
    %34 = vector.broadcast %cst_7 : f32 to vector<28x60xf32>
    %35 = arith.select %32, %33, %34 : vector<28x60xi1>, vector<28x60xf32>
    %36 = arith.truncf %35 : vector<28x60xf32> to vector<28x60xbf16>
    %c1_i32 = arith.constant 1 : i32
    %37 = vector.broadcast %c1_i32 : i32 to vector<28x60xi32>
    %38 = arith.addi %31, %37 : vector<28x60xi32>
    %39 = arith.cmpi eq, %23, %38 : vector<28x60xi32>
    %cst_8 = arith.constant 1.000000e+00 : f32
    %cst_9 = arith.constant 0.000000e+00 : f32
    %40 = vector.broadcast %cst_8 : f32 to vector<28x60xf32>
    %41 = vector.broadcast %cst_9 : f32 to vector<28x60xf32>
    %42 = arith.select %39, %40, %41 : vector<28x60xi1>, vector<28x60xf32>
    %43 = arith.truncf %42 : vector<28x60xf32> to vector<28x60xbf16>
    %cst_10 = arith.constant dense<0.000000e+00> : vector<28x128xf32>
    %44 = tpu.matmul %36, %21, %cst_10 {dimension_numbers = #tpu.dot_dimension_numbers<[1], [0], [0], [1], [0, 0, 1, 1], [], []>} : vector<28x60xbf16>, vector<60x128xbf16>, vector<28x128xf32> -> vector<28x128xf32>
    %cst_11 = arith.constant dense<0.000000e+00> : vector<28x128xf32>
    %45 = tpu.matmul %43, %21, %cst_11 {dimension_numbers = #tpu.dot_dimension_numbers<[1], [0], [0], [1], [0, 0, 1, 1], [], []>} : vector<28x60xbf16>, vector<60x128xbf16>, vector<28x128xf32> -> vector<28x128xf32>
    %46 = arith.maximumf %44, %45 : vector<28x128xf32>
    %47 = vector.extract_strided_slice %46 {offsets = [0, 0], sizes = [28, 64], strides = [1, 1]} : vector<28x128xf32> to vector<28x64xf32>
    %48 = vector.extract_strided_slice %46 {offsets = [0, 64], sizes = [28, 64], strides = [1, 1]} : vector<28x128xf32> to vector<28x64xf32>
    %49 = arith.maximumf %47, %48 : vector<28x64xf32>
    %50 = arith.truncf %49 : vector<28x64xf32> to vector<28x64xbf16>
    %c0_12 = arith.constant 0 : index
    %c0_13 = arith.constant 0 : index
    %51 = vector.load %arg3[%c0_12, %c0_13] : memref<64x640xbf16, #tpu.memory_space<vmem>>, vector<64x640xbf16>
    %cst_14 = arith.constant dense<0.000000e+00> : vector<28x640xf32>
    %52 = tpu.matmul %50, %51, %cst_14 {dimension_numbers = #tpu.dot_dimension_numbers<[1], [0], [0], [1], [0, 0, 1, 1], [], []>} : vector<28x64xbf16>, vector<64x640xbf16>, vector<28x640xf32> -> vector<28x640xf32>
    %53 = vector.extract_strided_slice %52 {offsets = [0, 0], sizes = [24, 128], strides = [1, 1]} : vector<28x640xf32> to vector<24x128xf32>
    %54 = vector.extract_strided_slice %52 {offsets = [1, 128], sizes = [24, 128], strides = [1, 1]} : vector<28x640xf32> to vector<24x128xf32>
    %55 = arith.addf %53, %54 : vector<24x128xf32>
    %56 = vector.extract_strided_slice %52 {offsets = [2, 256], sizes = [24, 128], strides = [1, 1]} : vector<28x640xf32> to vector<24x128xf32>
    %57 = arith.addf %55, %56 : vector<24x128xf32>
    %58 = vector.extract_strided_slice %52 {offsets = [3, 384], sizes = [24, 128], strides = [1, 1]} : vector<28x640xf32> to vector<24x128xf32>
    %59 = arith.addf %57, %58 : vector<24x128xf32>
    %60 = vector.extract_strided_slice %52 {offsets = [4, 512], sizes = [24, 128], strides = [1, 1]} : vector<28x640xf32> to vector<24x128xf32>
    %61 = arith.addf %59, %60 : vector<24x128xf32>
    %62 = vector.broadcast %2 : vector<1x128xf32> to vector<24x128xf32>
    %63 = arith.addf %61, %62 : vector<24x128xf32>
    %cst_15 = arith.constant 0.000000e+00 : f32
    %64 = vector.broadcast %cst_15 : f32 to vector<24x128xf32>
    %65 = arith.maximumf %63, %64 : vector<24x128xf32>
    %66 = arith.truncf %65 : vector<24x128xf32> to vector<24x128xbf16>
    %67 = tpu.iota {dimensions = array<i32: 0>} : vector<10x24xi32>
    %68 = tpu.iota {dimensions = array<i32: 1>} : vector<10x24xi32>
    %c2_i32_16 = arith.constant 2 : i32
    %69 = vector.broadcast %c2_i32_16 : i32 to vector<10x24xi32>
    %70 = arith.muli %69, %67 : vector<10x24xi32>
    %c5_i32 = arith.constant 5 : i32
    %71 = vector.broadcast %c5_i32 : i32 to vector<10x24xi32>
    %72 = arith.cmpi sge, %67, %71 : vector<10x24xi32>
    %c4_i32_17 = arith.constant 4 : i32
    %c0_i32_18 = arith.constant 0 : i32
    %73 = vector.broadcast %c4_i32_17 : i32 to vector<10x24xi32>
    %74 = vector.broadcast %c0_i32_18 : i32 to vector<10x24xi32>
    %75 = arith.select %72, %73, %74 : vector<10x24xi1>, vector<10x24xi32>
    %76 = arith.addi %70, %75 : vector<10x24xi32>
    %77 = arith.cmpi eq, %68, %76 : vector<10x24xi32>
    %cst_19 = arith.constant 1.000000e+00 : f32
    %cst_20 = arith.constant 0.000000e+00 : f32
    %78 = vector.broadcast %cst_19 : f32 to vector<10x24xf32>
    %79 = vector.broadcast %cst_20 : f32 to vector<10x24xf32>
    %80 = arith.select %77, %78, %79 : vector<10x24xi1>, vector<10x24xf32>
    %81 = arith.truncf %80 : vector<10x24xf32> to vector<10x24xbf16>
    %c1_i32_21 = arith.constant 1 : i32
    %82 = vector.broadcast %c1_i32_21 : i32 to vector<10x24xi32>
    %83 = arith.addi %76, %82 : vector<10x24xi32>
    %84 = arith.cmpi eq, %68, %83 : vector<10x24xi32>
    %cst_22 = arith.constant 1.000000e+00 : f32
    %cst_23 = arith.constant 0.000000e+00 : f32
    %85 = vector.broadcast %cst_22 : f32 to vector<10x24xf32>
    %86 = vector.broadcast %cst_23 : f32 to vector<10x24xf32>
    %87 = arith.select %84, %85, %86 : vector<10x24xi1>, vector<10x24xf32>
    %88 = arith.truncf %87 : vector<10x24xf32> to vector<10x24xbf16>
    %cst_24 = arith.constant dense<0.000000e+00> : vector<10x128xf32>
    %89 = tpu.matmul %81, %66, %cst_24 {dimension_numbers = #tpu.dot_dimension_numbers<[1], [0], [0], [1], [0, 0, 1, 1], [], []>} : vector<10x24xbf16>, vector<24x128xbf16>, vector<10x128xf32> -> vector<10x128xf32>
    %cst_25 = arith.constant dense<0.000000e+00> : vector<10x128xf32>
    %90 = tpu.matmul %88, %66, %cst_25 {dimension_numbers = #tpu.dot_dimension_numbers<[1], [0], [0], [1], [0, 0, 1, 1], [], []>} : vector<10x24xbf16>, vector<24x128xbf16>, vector<10x128xf32> -> vector<10x128xf32>
    %91 = arith.maximumf %89, %90 : vector<10x128xf32>
    %92 = vector.extract_strided_slice %91 {offsets = [0, 0], sizes = [10, 64], strides = [1, 1]} : vector<10x128xf32> to vector<10x64xf32>
    %93 = vector.extract_strided_slice %91 {offsets = [0, 64], sizes = [10, 64], strides = [1, 1]} : vector<10x128xf32> to vector<10x64xf32>
    %94 = arith.maximumf %92, %93 : vector<10x64xf32>
    %95 = vector.extract_strided_slice %94 {offsets = [0, 0], sizes = [5, 64], strides = [1, 1]} : vector<10x64xf32> to vector<5x64xf32>
    %96 = arith.mulf %95, %4 : vector<5x64xf32>
    %cst_26 = arith.constant dense<0.000000e+00> : vector<5xf32>
    %97 = vector.multi_reduction <add>, %96, %cst_26 [1] : vector<5x64xf32> to vector<5xf32>
    %98 = vector.shape_cast %97 : vector<5xf32> to vector<5x1xf32>
    %cst_27 = arith.constant dense<0.000000e+00> : vector<1xf32>
    %99 = vector.multi_reduction <add>, %98, %cst_27 [0] : vector<5x1xf32> to vector<1xf32>
    %100 = vector.shape_cast %99 : vector<1xf32> to vector<1x1xf32>
    %101 = arith.addf %100, %3 : vector<1x1xf32>
    %102 = vector.extract_strided_slice %94 {offsets = [5, 0], sizes = [5, 64], strides = [1, 1]} : vector<10x64xf32> to vector<5x64xf32>
    %103 = arith.mulf %102, %4 : vector<5x64xf32>
    %cst_28 = arith.constant dense<0.000000e+00> : vector<5xf32>
    %104 = vector.multi_reduction <add>, %103, %cst_28 [1] : vector<5x64xf32> to vector<5xf32>
    %105 = vector.shape_cast %104 : vector<5xf32> to vector<5x1xf32>
    %cst_29 = arith.constant dense<0.000000e+00> : vector<1xf32>
    %106 = vector.multi_reduction <add>, %105, %cst_29 [0] : vector<5x1xf32> to vector<1xf32>
    %107 = vector.shape_cast %106 : vector<1xf32> to vector<1x1xf32>
    %108 = arith.addf %107, %3 : vector<1x1xf32>
    %109 = tpu.iota {dimensions = array<i32: 0>} : vector<8x128xi32>
    %110 = tpu.iota {dimensions = array<i32: 1>} : vector<8x128xi32>
    %c0_i32_30 = arith.constant 0 : i32
    %111 = vector.broadcast %c0_i32_30 : i32 to vector<8x128xi32>
    %112 = arith.cmpi eq, %109, %111 : vector<8x128xi32>
    %c0_i32_31 = arith.constant 0 : i32
    %113 = vector.broadcast %c0_i32_31 : i32 to vector<8x128xi32>
    %114 = arith.cmpi eq, %110, %113 : vector<8x128xi32>
    %115 = arith.andi %112, %114 : vector<8x128xi1>
    %c1_i32_32 = arith.constant 1 : i32
    %116 = vector.broadcast %c1_i32_32 : i32 to vector<8x128xi32>
    %117 = arith.cmpi eq, %109, %116 : vector<8x128xi32>
    %c0_i32_33 = arith.constant 0 : i32
    %118 = vector.broadcast %c0_i32_33 : i32 to vector<8x128xi32>
    %119 = arith.cmpi eq, %110, %118 : vector<8x128xi32>
    %120 = arith.andi %117, %119 : vector<8x128xi1>
    %cst_34 = arith.constant 0.000000e+00 : f32
    %121 = vector.shape_cast %108 : vector<1x1xf32> to vector<1x1xf32>
    %122 = vector.broadcast %121 : vector<1x1xf32> to vector<8x128xf32>
    %123 = vector.broadcast %cst_34 : f32 to vector<8x128xf32>
    %124 = arith.select %120, %122, %123 : vector<8x128xi1>, vector<8x128xf32>
    %125 = vector.shape_cast %101 : vector<1x1xf32> to vector<1x1xf32>
    %126 = vector.broadcast %125 : vector<1x1xf32> to vector<8x128xf32>
    %127 = arith.select %115, %126, %124 : vector<8x128xi1>, vector<8x128xf32>
    %c0_35 = arith.constant 0 : index
    %c0_36 = arith.constant 0 : index
    %128 = vector.load %arg5[%c0_35, %c0_36] : memref<8x128xf32, #tpu.memory_space<vmem>>, vector<8x128xf32>
    tpu.vector_store %arg5[%c0_35, %c0_36], %127 {strides = array<i32>} : memref<8x128xf32, #tpu.memory_space<vmem>>, vector<8x128xf32>,
    return
  }
  func.func @transform_0(%arg0: i32) -> (i32, i32) {
    %c0_i32 = arith.constant 0 : i32
    %c0_i32_0 = arith.constant 0 : i32
    %c0_i32_1 = arith.constant 0 : i32
    return %c0_i32, %c0_i32_0 : i32, i32
  }
  func.func @transform_1(%arg0: i32) -> (i32, i32) {
    %c0_i32 = arith.constant 0 : i32
    %c0_i32_0 = arith.constant 0 : i32
    %c0_i32_1 = arith.constant 0 : i32
    return %c0_i32, %c0_i32_0 : i32, i32
  }
  func.func @transform_2(%arg0: i32) -> (i32, i32) {
    %c0_i32 = arith.constant 0 : i32
    %c0_i32_0 = arith.constant 0 : i32
    %c0_i32_1 = arith.constant 0 : i32
    return %c0_i32, %c0_i32_0 : i32, i32
  }
  func.func @transform_3(%arg0: i32) -> (i32, i32) {
    %c0_i32 = arith.constant 0 : i32
    %c0_i32_0 = arith.constant 0 : i32
    %c0_i32_1 = arith.constant 0 : i32
    return %c0_i32, %c0_i32_0 : i32, i32
  }
  func.func @transform_4(%arg0: i32) -> (i32, i32) {
    %c0_i32 = arith.constant 0 : i32
    %c0_i32_0 = arith.constant 0 : i32
    %c0_i32_1 = arith.constant 0 : i32
    return %c0_i32, %c0_i32_0 : i32, i32
  }
}

</mosaic_0001>

<bundles_post_ra>
// kernel: tpu_custom_call.1
= control target key start
LH: loop header
LB: loop body
LE: loop exit
PB: predicated region body
PF: predicated region fallthrough
CT: control target
= control target key end

     0   :  { %9 = vsyncpa [#allocation3], 0  ;;  %s1873_s0 = inlined_call_operand.vmem [shape: bf16[64,32], index: 0, kind: input, shape index: {}]   ;;  %s1874_s1 = inlined_call_operand.hbm [shape: bf16[32,640], index: 1, kind: input, shape index: {}]   ;;  %s1875_s2 = inlined_call_operand.hbm [shape: bf16[64,640], index: 2, kind: input, shape index: {}]   ;;  %s1876_s3 = inlined_call_operand.vmem [shape: f32[8,128], index: 3, kind: input, shape index: {}]   ;;  %s1877_s4 = inlined_call_operand.hbm [shape: f32[8,128], index: 4, kind: output, shape index: {}]  }
   0x1   :  { %10 = vsyncpa [#allocation6], 0 }
   0x2   :  { %11 = vsyncpa [#allocation4], 0  ;;  %s1592_s15 = smov [#allocation2]  }
   0x3   :  { %s19_s16 = sshll.u32 %s1592_s15, 4  ;;  %s20_s16 = int_to_ptr.vmem [resolvable:$true] %s19_s16 }
   0x4   :  { %s1534_s17 = scalar_lea.vmem %s20_s16, 1280  ;;  %p1539_p1 = scmp.lt.s32.totalorder %s20_s16, %s20_s16 }
   0x5   :  { %p1535_p0 = scmp.ne.s32.totalorder %s20_s16, %s1534_s17  ;;  %p1540_p2 = scmp.lt.s32.totalorder %s1534_s17, %s1534_s17 }
   0x7   :  { %p1541_p3 = por %p1540_p2, %p1539_p1 }
   0x9   :  { %p1542_p4 = pnand %p1541_p3, %p1535_p0 }
   0xb   :  { %1545 = shalt.err (!%p1542_p4)
}
   0xc   :  { %s1593_s18 = smov 320   ;;  %s1594_s19 = smov 20  }
   0xd   :  { %25 = dma.hbm_to_vmem [thread:$0]  %s1874_s1, 1280, %s20_s16, [#allocation3], %s1593_s18, %s1593_s18, %s1594_s19  }
   0xe   :  { %s1595_s22 = smov [#allocation5]  }
   0xf   :  { %s31_s23 = sshll.u32 %s1595_s22, 4  ;;  %s32_s23 = int_to_ptr.vmem [resolvable:$true] %s31_s23 }
  0x10   :  { %s1554_s24 = scalar_lea.vmem %s32_s23, 2560  ;;  %p1559_p6 = scmp.lt.s32.totalorder %s32_s23, %s32_s23 }
  0x11   :  { %p1555_p5 = scmp.ne.s32.totalorder %s32_s23, %s1554_s24  ;;  %p1560_p7 = scmp.lt.s32.totalorder %s1554_s24, %s1554_s24 }
  0x13   :  { %p1561_p8 = por %p1560_p7, %p1559_p6 }
  0x15   :  { %p1562_p9 = pnand %p1561_p8, %p1555_p5 }
  0x17   :  { %1565 = shalt.err (!%p1562_p9)
}
  0x18   :  { %37 = dma.hbm_to_vmem [thread:$0]  %s1875_s2, 2560, %s32_s23, [#allocation6], %s1593_s18, %s1593_s18, %s1594_s19  }
  0x19   :  { %1586 = dma.done.wait [#allocation3], 1280  }
  0x1a   :  { %1587 = vsyncadd [#allocation3], 4294966016 }
  0x1b   :  { %1588 = dma.done.wait [#allocation6], 2560  }
  0x1c   :  { %1589 = vsyncadd [#allocation6], 4294964736  ;;  %v1596_v0 = vmov 0   ;;  %v1480_v1 = vld [vmem:[#allocation2 + $0x2c] ss:$20 sps:$4 sm:$0xff]   ;;  %vm140_vm0 = vcmask 261120   ;;  %v524_v15 = vlaneseq }
  0x1d   :  { %185 = vmatprep.mubr.bf16.mxu0 %v1596_v0  ;;  %258 = vmatprep.mubr.bf16.mxu1 %v1596_v0  ;;  %v1482_v2 = vld [vmem:[#allocation2 + $0x28] ss:$20 sps:$4 sm:$0xff]   ;;  %v1485_v4 = vld [vmem:[#allocation2 + $0x30] ss:$20 sps:$4 sm:$0xff]   ;;  %v1488_v6 = vld [vmem:[#allocation2] ss:$20 sps:$4 sm:$0xff]  }
  0x1e   :  { %165 = vmatprep.subr.bf16.mxu0 %v1480_v1  ;;  %v1483_v3 = vld [vmem:[#allocation2 + $0x34] ss:$20 sps:$4 sm:$0xff]   ;;  %v1486_v5 = vld [vmem:[#allocation2 + $0x4] ss:$20 sps:$4 sm:$0xff]   ;;  %v1489_v7 = vld [vmem:[#allocation2 + $0xc] ss:$20 sps:$4 sm:$0xff]  }
  0x1f   :  { %166 = vmatpush1.bf16.msra.mxu0 %v1482_v2  ;;  %238 = vmatprep.subr.bf16.mxu1 %v1483_v3  ;;  %v1491_v8 = vld [vmem:[#allocation2 + $0x8] ss:$20 sps:$4 sm:$0xff]   ;;  %v1492_v9 = vld [vmem:[%s1873_s0] sm:$0xff]   ;;  %v1495_v10 = vld [vmem:[#allocation2 + $0x38] ss:$20 sps:$4 sm:$0xff]   ;;  %v1664_v16 = vshrl.u32 %v524_v15, 7 }
  0x20   :  { %239 = vmatpush1.bf16.msra.mxu1 %v1485_v4  ;;  %167 = vmatprep.subr.bf16.mxu0 %v1486_v5  ;;  %v1497_v11 = vld [vmem:[#allocation2 + $0x10] ss:$20 sps:$4 sm:$0xff]   ;;  %v1493_v12 = vld [vmem:[%s1873_s0 + $0x8] sm:$0xff]   ;;  %v1496_v14 = vld [vmem:[%s1873_s0 + $0x18] sm:$0xff]   ;;  %v1672_v20 = vand.u32 127, %v524_v15  ;;  %v1597_v25 = vmov 0.0  }
  0x21   :  { %240 = vmatprep.subr.bf16.mxu1 %v1489_v7  ;;  %v1494_v13 = vld [vmem:[%s1873_s0 + $0x10] sm:$0xff]   ;;  %v1667_v17 = vadd.s32 8, %v1664_v16  ;;  %v1675_v21 = vmul.u32 2, %v1664_v16  ;;  %vm595_vm6 = vcmask 490496   ;;  %vm372_vm7 = vcmask 1046528   ;;  %v1727_v3 = vld [vmem:[%s1876_s3] sm:$0xff] }
  0x22   :  { %vm412_vm8 = vcmask 1045504   ;;  %v526_v2 = vsub.s32 0, %v1664_v16  ;;  %v1730_v4 = vadd.s32 16, %v1664_v16  ;;  %vm452_vm9 = vcmask 1044480   ;;  %s1598_s3 = smov 64   ;;  %s1600_s8 = smov [#allocation7]  }
  0x23   :  { %168 = vmatpush1.bf16.msra.mxu0 %v1488_v6  ;;  %v556_v18 = vmul.u32 2, %v1667_v17  ;;  %vm560_vm1 = vcmp.ge.s32.totalorder %v1667_v17, 14  ;;  %v581_v23 = vadd.s32 1, %v1675_v21  ;;  %vm571_vm2 = vcmp.eq.s32.totalorder %v1672_v20, %v1675_v21  ;;  %s1293_s9 = sshll.u32 %s1600_s8, 4  ;;  %s1294_s9 = int_to_ptr.vmem [resolvable:$true] %s1293_s9 }
  0x24   :  { %241 = vmatpush1.bf16.msra.mxu1 %v1491_v8  ;;  %1391 = vmatprep.subr.bf16.mxu0 %v1495_v10  ;;  %v564_v19 = vsel %vm560_vm1, 4, %v1596_v0  ;;  %v575_v26 = vsel %vm571_vm2, 1.0, %v1597_v25  ;;  %vm492_vm10 = vcmask 1043456   ;;  %vm863_vm15 = vcmask 523264   ;;  %s1566_s12 = scalar_lea.vmem %s1294_s9, 128  ;;  %p1571_p11 = scmp.lt.s32.totalorder %s1294_s9, %s1294_s9 }
  0x25   :  { %v568_v22 = vadd.s32 %v564_v19, %v556_v18  ;;  %vm585_vm4 = vcmp.eq.s32.totalorder %v1672_v20, %v581_v23  ;;  %vm1104_vm1 = vcmp.ge.s32.totalorder %v1664_v16, 5  ;;  %p1567_p10 = scmp.ne.s32.totalorder %s1294_s9, %s1566_s12  ;;  %p1572_p12 = scmp.lt.s32.totalorder %s1566_s12, %s1566_s12 }
  0x26   :  { %1317 = vmatmul.mubr.msk.bf16.vlgmr.msra.gmra.mxu0 %vm140_vm0, %v1492_v9  ;;  %v589_v28 = vsel %vm585_vm4, 1.0, %v1597_v25 }
  0x27   :  { %195 = vmatprep.mubr.bf16.mxu0 %v1596_v0  ;;  %1321 = vmatmul.mubr.msk.bf16.vlgmr.msra.gmra.mxu1 %vm140_vm0, %v1492_v9  ;;  %v582_v24 = vadd.s32 1, %v568_v22  ;;  %vm572_vm3 = vcmp.eq.s32.totalorder %v1672_v20, %v568_v22  ;;  %v1739_v22 = vrot.slane %v1727_v3, %v526_v2  ;;  %p1573_p13 = por %p1572_p12, %p1571_p11 }
  0x28   :  { %1392 = vmatpush3.bf16.msra.mxu0 %v1495_v10  ;;  %268 = vmatprep.mubr.bf16.mxu1 %v1596_v0  ;;  %v576_v27 = vsel %vm572_vm3, 1.0, %v1597_v25 }
  0x29   :  { %1393 = vmatprep.subr.bf16.mxu0 %v1497_v11  ;;  %vm586_vm5 = vcmp.eq.s32.totalorder %v1672_v20, %v582_v24  ;;  %v579_v29 = vpack.c.bf16 %v576_v27, %v575_v26  ;;  %v1742_v26 = vadd.s32 24, %v1664_v16  ;;  %v557_v27 = vmul.u32 2, %v1730_v4  ;;  %p1574_p0 = pnand %p1573_p13, %p1567_p10 }
  0x2a   :  { %v590_v30 = vsel %vm586_vm5, 1.0, %v1597_v25 }
  0x2b   :  { %v593_v31 = vpack.c.bf16 %v590_v30, %v589_v28 }
  0x2c   :  { %1394 = vmatpush3.bf16.msra.mxu0 %v1497_v11 }
  0x2e   :  { %1318 = vmatmul.mubr.msk.bf16.gmra.mxu0 %vm140_vm0, %v1493_v12 }
  0x2f   :  { %205 = vmatprep.mubr.bf16.mxu0 %v1596_v0  ;;  %1322 = vmatmul.mubr.msk.bf16.gmra.mxu1 %vm140_vm0, %v1493_v12 }
  0x30   :  { %278 = vmatprep.mubr.bf16.mxu1 %v1596_v0 }
  0x36   :  { %1319 = vmatmul.mubr.msk.bf16.gmra.mxu0 %vm140_vm0, %v1494_v13 }
  0x37   :  { %215 = vmatprep.mubr.bf16.mxu0 %v1596_v0  ;;  %1323 = vmatmul.mubr.msk.bf16.gmra.mxu1 %vm140_vm0, %v1494_v13 }
  0x38   :  { %288 = vmatprep.mubr.bf16.mxu1 %v1596_v0 }
  0x3e   :  { %1320 = vmatmul.mubr.msk.bf16.gmra.mxu0 %vm140_vm0, %v1496_v14 }
  0x3f   :  { %1395 = vmatprep.mubr.msk.bf16.mxu0 %vm140_vm0, %v1492_v9  ;;  %1324 = vmatmul.mubr.msk.bf16.gmra.mxu1 %vm140_vm0, %v1496_v14 }
  0x40   :  { %1411 = vmatprep.mubr.msk.bf16.mxu1 %vm595_vm6, %v579_v29 }
  0x46   :  { %1396 = vmatmul.mubr.msk.bf16.vlgmr.msra.gmra.mxu0 %vm140_vm0, %v1493_v12 }
  0x47   :  { %1399 = vmatprep.mubr.msk.bf16.mxu0 %vm140_vm0, %v1494_v13 }
  0x4e   :  { %1400 = vmatmul.mubr.msk.bf16.gmra.mxu0 %vm140_vm0, %v1496_v14  ;;  %vm1599_vm0 = vmmov 0  }
  0x4f   :  { %1423 = vmatprep.mubr.msk.bf16.mxu0 %vm595_vm6, %v593_v31 }
  0xe6   :  { %v187_v32 = vpop.f32.mrf.mxu0 }
  0xe7   :  { %v260_v34 = vpop.f32.mrf.mxu1 }
  0xe8   :  { %v189_v33 = vpop.f32.mrf.mxu0  ;;  %v413_v59 = vrot.slane %v260_v34, 2 }
  0xe9   :  { %v262_v36 = vpop.f32.mrf.mxu1  ;;  %v373_v56 = vrot.slane %v189_v33, 1 }
  0xea   :  { %v1691_v35 = vpop.f32.mrf.mxu0  ;;  %v453_v5 = vrot.slane %v262_v36, 3 }
  0xeb   :  { %v1693_v38 = vpop.f32.mrf.mxu1 }
  0xec   :  { %v193_v37 = vpop.f32.mrf.mxu0  ;;  %v414_v61 = vrot.slane %v1693_v38, 2 }
  0xed   :  { %v1695_v40 = vpop.f32.mrf.mxu1  ;;  %v374_v53 = vrot.slane %v193_v37, 1 }
  0xee   :  { %v197_v39 = vpop.f32.mrf.mxu0  ;;  %v454_v7 = vrot.slane %v1695_v40, 3  ;;  %v415_v10 = vsel %vm412_vm8, %v413_v59, %v414_v61 }
  0xef   :  { %v1697_v42 = vpop.f32.mrf.mxu1  ;;  %v375_v60 = vsel %vm372_vm7, %v373_v56, %v374_v53 }
  0xf0   :  { %v199_v41 = vpop.f32.mrf.mxu0  ;;  %v396_v6 = vadd.f32 %v375_v60, %v187_v32  ;;  %v455_v29 = vsel %vm452_vm9, %v453_v5, %v454_v7  ;;  %v416_v30 = vrot.slane %v1697_v42, 2 }
  0xf1   :  { %v1701_v44 = vpop.f32.mrf.mxu1  ;;  %v376_v8 = vrot.slane %v199_v41, 1 }
  0xf2   :  { %v1699_v43 = vpop.f32.mrf.mxu0  ;;  %v436_v28 = vadd.f32 %v415_v10, %v396_v6  ;;  %v456_v40 = vrot.slane %v1701_v44, 3 }
  0xf3   :  { %v1703_v46 = vpop.f32.mrf.mxu1  ;;  %v377_v34 = vsel %vm372_vm7, %v374_v53, %v376_v8 }
  0xf4   :  { %v203_v45 = vpop.f32.mrf.mxu0  ;;  %v418_v13 = vrot.slane %v1703_v46, 2 }
  0xf5   :  { %v1707_v48 = vpop.f32.mrf.mxu1  ;;  %v378_v62 = vrot.slane %v203_v45, 1 }
  0xf6   :  { %v1705_v47 = vpop.f32.mrf.mxu0  ;;  %v458_v31 = vrot.slane %v1707_v48, 3  ;;  %v419_v41 = vsel %vm412_vm8, %v416_v30, %v418_v13 }
  0xf7   :  { %v1709_v50 = vpop.f32.mrf.mxu1  ;;  %v379_v12 = vsel %vm372_vm7, %v376_v8, %v378_v62 }
  0xf8   :  { %v209_v49 = vpop.f32.mrf.mxu0  ;;  %v398_v36 = vadd.f32 %v379_v12, %v197_v39  ;;  %v420_v38 = vrot.slane %v1709_v50, 2  ;;  %v417_v50 = vsel %vm412_vm8, %v414_v61, %v416_v30  ;;  %v459_v44 = vsel %vm452_vm9, %v456_v40, %v458_v31 }
  0xf9   :  { %v1713_v52 = vpop.f32.mrf.mxu1  ;;  %v380_v11 = vrot.slane %v209_v49, 1  ;;  %v476_v12 = vadd.f32 %v455_v29, %v436_v28 }
  0xfa   :  { %v1711_v51 = vpop.f32.mrf.mxu0 }
  0xfb   :  { %v1715_v55 = vpop.f32.mrf.mxu1  ;;  %v381_v37 = vsel %vm372_vm7, %v378_v62, %v380_v11  ;;  %v421_v62 = vsel %vm412_vm8, %v418_v13, %v420_v38 }
  0xfc   :  { %v213_v54 = vpop.f32.mrf.mxu0  ;;  %v422_v42 = vrot.slane %v1715_v55, 2  ;;  %v399_v56 = vadd.f32 %v381_v37, %v1699_v43  ;;  %v438_v55 = vadd.f32 %v419_v41, %v398_v36 }
  0xfd   :  { %v1719_v58 = vpop.f32.mrf.mxu1  ;;  %v382_v14 = vrot.slane %v213_v54, 1  ;;  %v397_v54 = vadd.f32 %v377_v34, %v1691_v35 }
  0xfe   :  { %v1717_v57 = vpop.f32.mrf.mxu0  ;;  %v423_v5 = vsel %vm412_vm8, %v420_v38, %v422_v42  ;;  %v462_v43 = vrot.slane %v1719_v58, 3  ;;  %v439_v13 = vadd.f32 %v421_v62, %v399_v56 }
  0xff   :  { %v290_v1 = vpop.f32.mrf.mxu1  ;;  %v383_v45 = vsel %vm372_vm7, %v380_v11, %v382_v14 }
 0x100   :  { %v219_v63 = vpop.f32.mrf.mxu0  ;;  %v424_v49 = vrot.slane %v290_v1, 2  ;;  %v400_v2 = vadd.f32 %v383_v45, %v1705_v47  ;;  %v558_v47 = vmul.u32 2, %v1742_v26 }
 0x101   :  { %v1736_v15 = vpop.f32.mrf.mxu1  ;;  %v384_v23 = vrot.slane %v219_v63, 1  ;;  %v460_v63 = vrot.slane %v1713_v52, 3 }
 0x102   :  { %v221_v9 = vpop.f32.mrf.mxu0  ;;  %v425_v8 = vsel %vm412_vm8, %v422_v42, %v424_v49  ;;  %v464_v52 = vrot.slane %v1736_v15, 3  ;;  %v440_v58 = vadd.f32 %v423_v5, %v400_v2 }
 0x103   :  { %v294_v32 = vpop.f32.mrf.mxu1  ;;  %v385_v48 = vsel %vm372_vm7, %v382_v14, %v384_v23  ;;  %v437_v14 = vadd.f32 %v417_v50, %v397_v54  ;;  %v463_v34 = vsel %vm452_vm9, %v460_v63, %v462_v43 }
 0x104   :  { %v223_v19 = vpop.f32.mrf.mxu0  ;;  %v426_v39 = vrot.slane %v294_v32, 2  ;;  %v401_v35 = vadd.f32 %v385_v48, %v1711_v51  ;;  %v457_v51 = vsel %vm452_vm9, %v454_v7, %v456_v40  ;;  %v465_v26 = vsel %vm452_vm9, %v462_v43, %v464_v52 }
 0x105   :  { %v386_v24 = vrot.slane %v223_v19, 1  ;;  %v296_v59 = vpop.f32.mrf.mxu1  ;;  %v478_v19 = vadd.f32 %v459_v44, %v438_v55  ;;  %v480_v42 = vadd.f32 %v463_v34, %v440_v58  ;;  %v477_v62 = vadd.f32 %v457_v51, %v437_v14 }
 0x106   :  { %v1748_v33 = vpop.f32.mrf.mxu0  ;;  %v427_v10 = vsel %vm412_vm8, %v424_v49, %v426_v39  ;;  %v466_v11 = vrot.slane %v296_v59, 3  ;;  %v570_v14 = vadd.s32 4, %v558_v47 }
 0x107   :  { %v387_v53 = vsel %vm372_vm7, %v384_v23, %v386_v24  ;;  %v403_v1 = vadd.f32 %v386_v24, %v221_v9  ;;  %v461_v23 = vsel %vm452_vm9, %v458_v31, %v460_v63  ;;  %v441_v24 = vadd.f32 %v425_v8, %v401_v35 }
 0x108   :  { %v1757_v46 = vpop.f32.mrf.mxu0  ;;  %v402_v61 = vadd.f32 %v387_v53, %v1717_v57  ;;  %v467_v28 = vsel %vm452_vm9, %v464_v52, %v466_v11  ;;  %v479_v36 = vadd.f32 %v461_v23, %v439_v13  ;;  %v496_v37 = vrot.slane %v1748_v33, 4 }
 0x109   :  { %v443_v57 = vadd.f32 %v426_v39, %v403_v1  ;;  %v481_v48 = vadd.f32 %v465_v26, %v441_v24  ;;  %v493_v53 = vrot.slane %v1757_v46, 4  ;;  %v584_v47 = vadd.s32 1, %v570_v14 }
 0x10a   :  { %v1398_v60 = vpop.f32.mrf.mxu0  ;;  %v442_v30 = vadd.f32 %v427_v10, %v402_v61  ;;  %vm574_vm12 = vcmp.eq.s32.totalorder %v1672_v20, %v570_v14 }
 0x10b   :  { %v498_v29 = vrot.slane %v1398_v60, 4  ;;  %v483_v40 = vadd.f32 %v466_v11, %v443_v57  ;;  %vm588_vm14 = vcmp.eq.s32.totalorder %v1672_v20, %v584_v47  ;;  %v1525_v47 = vld [vmem:[#allocation5 + $0x10] ss:$20 sps:$4 sm:$0xff]  }
 0x10c   :  { %v336_v6 = vpop.f32.mrf.mxu0  ;;  %v482_v49 = vadd.f32 %v467_v28, %v442_v30 }
 0x10d   :  { %v494_v7 = vrot.slane %v336_v6, 4  ;;  %v499_v54 = vsel %vm492_vm10, %v496_v37, %v498_v29 }
 0x10e   :  { %v1401_v9 = vpop.f32.mrf.mxu0  ;;  %v518_v2 = vadd.f32 %v499_v54, %v478_v19  ;;  %v1515_v54 = vld [vmem:[#allocation5 + $0x34] ss:$20 sps:$4 sm:$0xff]  }
 0x10f   :  { %v504_v41 = vrot.slane %v1401_v9, 4  ;;  %v495_v33 = vsel %vm492_vm10, %v493_v53, %v494_v7  ;;  %v497_v59 = vsel %vm492_vm10, %v494_v7, %v496_v37  ;;  %v569_v9 = vadd.s32 4, %v557_v27  ;;  %v1507_v53 = vld [vmem:[#allocation5 + $0x58] ss:$20 sps:$4 sm:$0xff]  }
 0x110   :  { %v349_v32 = vpop.f32.mrf.mxu0  ;;  %v516_v6 = vadd.f32 %v495_v33, %v476_v12  ;;  %v517_v43 = vadd.f32 %v497_v59, %v477_v62  ;;  %v530_v51 = vadd.f32 %v1739_v22, %v518_v2  ;;  %v592_v37 = vsel %vm588_vm14, 1.0, %v1597_v25  ;;  %v1521_v33 = vld [vmem:[#allocation5 + $0xc] ss:$20 sps:$4 sm:$0xff]  }
 0x111   :  { %v500_v15 = vrot.slane %v349_v32, 4  ;;  %v583_v27 = vadd.s32 1, %v569_v9  ;;  %vm573_vm11 = vcmp.eq.s32.totalorder %v1672_v20, %v569_v9  ;;  %v1516_v59 = vld [vmem:[#allocation5] ss:$20 sps:$4 sm:$0xff]  }
 0x112   :  { %v1402_v38 = vpop.f32.mrf.mxu0  ;;  %v528_v12 = vadd.f32 %v1739_v22, %v516_v6  ;;  %v529_v58 = vadd.f32 %v1739_v22, %v517_v43  ;;  %v538_v4 = vmax.f32 %v530_v51, 0.0 }
 0x113   :  { %v501_v31 = vsel %vm492_vm10, %v498_v29, %v500_v15  ;;  %v506_v45 = vrot.slane %v1402_v38, 4  ;;  %vm587_vm13 = vcmp.eq.s32.totalorder %v1672_v20, %v583_v27 }
 0x114   :  { %v352_v39 = vpop.f32.mrf.mxu0  ;;  %v519_v60 = vadd.f32 %v501_v31, %v479_v36  ;;  %v536_v34 = vmax.f32 %v528_v12, 0.0  ;;  %v537_v28 = vmax.f32 %v529_v58, 0.0  ;;  %v578_v36 = vsel %vm574_vm12, 1.0, %v1597_v25  ;;  %v1501_v31 = vld [vmem:[#allocation5 + $0x80] ss:$20 sps:$4 sm:$0xff]  }
 0x115   :  { %v507_v50 = vsel %vm492_vm10, %v504_v41, %v506_v45  ;;  %v523_v44 = vadd.f32 %v506_v45, %v483_v40  ;;  %v502_v56 = vrot.slane %v352_v39, 4  ;;  %v591_v26 = vsel %vm587_vm13, 1.0, %v1597_v25  ;;  %v1498_v40 = vld [vmem:[#allocation5 + $0x78] ss:$20 sps:$4 sm:$0xff]  }
 0x116   :  { %v522_v55 = vadd.f32 %v507_v50, %v482_v49  ;;  %v531_v10 = vadd.f32 %v1739_v22, %v519_v60  ;;  %v594_v38 = vpack.c.bf16 %v592_v37, %v591_v26  ;;  %v1503_v45 = vld [vmem:[#allocation5 + $0x84] ss:$20 sps:$4 sm:$0xff]   ;;  %v1512_v39 = vld [vmem:[#allocation5 + $0x2c] ss:$20 sps:$4 sm:$0xff]   ;;  %v1510_v50 = vld [vmem:[#allocation5 + $0x28] ss:$20 sps:$4 sm:$0xff]  }
 0x117   :  { %v535_v63 = vadd.f32 %v1739_v22, %v523_v44  ;;  %v503_v1 = vsel %vm492_vm10, %v500_v15, %v502_v56  ;;  %v505_v46 = vsel %vm492_vm10, %v502_v56, %v504_v41  ;;  %v577_v15 = vsel %vm573_vm11, 1.0, %v1597_v25  ;;  %v1500_v41 = vld [vmem:[#allocation5 + $0x7c] ss:$20 sps:$4 sm:$0xff]   ;;  %v1518_v56 = vld [vmem:[#allocation5 + $0x4] ss:$20 sps:$4 sm:$0xff]  }
 0x118   :  { %v534_v5 = vadd.f32 %v1739_v22, %v522_v55  ;;  %v520_v35 = vadd.f32 %v503_v1, %v480_v42  ;;  %v521_v61 = vadd.f32 %v505_v46, %v481_v48  ;;  %v539_v24 = vmax.f32 %v531_v10, 0.0  ;;  %v1506_v42 = vld [vmem:[#allocation5 + $0x54] ss:$20 sps:$4 sm:$0xff]   ;;  %v1509_v48 = vld [vmem:[#allocation5 + $0x5c] ss:$20 sps:$4 sm:$0xff]  }
 0x119   :  { %v543_v8 = vmax.f32 %v535_v63, 0.0  ;;  %v580_v7 = vpack.c.bf16 %v578_v36, %v577_v15  ;;  %v1504_v49 = vld [vmem:[#allocation5 + $0x50] ss:$20 sps:$4 sm:$0xff]   ;;  %v1519_v60 = vld [vmem:[#allocation5 + $0x8] ss:$20 sps:$4 sm:$0xff]   ;;  %vm1256_vm11 = vcmask 1042432  }
 0x11a   :  { %v542_v11 = vmax.f32 %v534_v5, 0.0  ;;  %v532_v13 = vadd.f32 %v1739_v22, %v520_v35  ;;  %v533_v52 = vadd.f32 %v1739_v22, %v521_v61  ;;  %v545_v29 = vpack.c.bf16 %v539_v24, %v538_v4  ;;  %v1513_v44 = vld [vmem:[#allocation5 + $0x30] ss:$20 sps:$4 sm:$0xff]   ;;  %v1522_v46 = vld [vmem:[#allocation5 + $0x88] ss:$20 sps:$4 sm:$0xff]  }
 0x11b   :  { %v544_v22 = vpack.c.bf16 %v537_v28, %v536_v34  ;;  %v1523_v24 = vld [vmem:[#allocation5 + $0x60] ss:$20 sps:$4 sm:$0xff]   ;;  %v1524_v4 = vld [vmem:[#allocation5 + $0x38] ss:$20 sps:$4 sm:$0xff]   ;;  %vm1272_vm12 = vcmp.eq.s32.totalorder %v1664_v16, 1  ;;  %vm1269_vm13 = vcmp.eq.s32.totalorder %v1664_v16, 0 }
 0x11c   :  { %v547_v19 = vpack.c.bf16 %v543_v8, %v542_v11  ;;  %v540_v57 = vmax.f32 %v532_v13, 0.0  ;;  %v541_v23 = vmax.f32 %v533_v52, 0.0 }
 0x11e   :  { %1455 = vmatprep.subr.msk.bf16.mxu1 %vm412_vm8, %v547_v19  ;;  %1456 = vmatprep.subr.msk.bf16.mxu0 %vm412_vm8, %v547_v19  ;;  %v603_v30 = vsel %vm412_vm8, %v547_v19, 0  ;;  %v546_v32 = vpack.c.bf16 %v541_v23, %v540_v57 }
 0x11f   :  { %1404 = vmatpush3.bf16.msra.mxu1 %v603_v30  ;;  %1416 = vmatpush3.bf16.msra.mxu0 %v603_v30 }
 0x120   :  { %1405 = vmatprep.subr.bf16.mxu1 %v546_v32  ;;  %1417 = vmatprep.subr.bf16.mxu0 %v546_v32 }
 0x123   :  { %1406 = vmatpush3.bf16.msra.mxu1 %v546_v32  ;;  %1418 = vmatpush3.bf16.msra.mxu0 %v546_v32 }
 0x124   :  { %1407 = vmatprep.subr.bf16.mxu1 %v545_v29  ;;  %1419 = vmatprep.subr.bf16.mxu0 %v545_v29 }
 0x127   :  { %1408 = vmatpush3.bf16.msra.mxu1 %v545_v29  ;;  %1420 = vmatpush3.bf16.msra.mxu0 %v545_v29 }
 0x128   :  { %1409 = vmatprep.subr.bf16.mxu1 %v544_v22  ;;  %1421 = vmatprep.subr.bf16.mxu0 %v544_v22 }
 0x12b   :  { %1410 = vmatpush3.bf16.msra.mxu1 %v544_v22  ;;  %1422 = vmatpush3.bf16.msra.mxu0 %v544_v22 }
 0x12c   :  { %878 = vmatprep.subr.bf16.mxu1 %v1500_v41  ;;  %930 = vmatprep.subr.bf16.mxu0 %v1503_v45 }
 0x12e   :  { %1412 = vmatmul.mubr.msk.bf16.vlgmr.msra.gmra.mxu1 %vm595_vm6, %v580_v7  ;;  %1424 = vmatmul.mubr.msk.bf16.vlgmr.msra.gmra.mxu0 %vm595_vm6, %v594_v38  ;;  %vm1122_vm6 = vcmask 195584  }
 0x12f   :  { %902 = vmatprep.mubr.bf16.mxu1 %v1596_v0  ;;  %954 = vmatprep.mubr.bf16.mxu0 %v1596_v0 }
 0x130   :  { %879 = vmatpush1.bf16.msra.mxu1 %v1498_v40  ;;  %931 = vmatpush1.bf16.msra.mxu0 %v1501_v31 }
 0x131   :  { %880 = vmatprep.subr.bf16.mxu1 %v1506_v42  ;;  %932 = vmatprep.subr.bf16.mxu0 %v1509_v48 }
 0x134   :  { %881 = vmatpush1.bf16.msra.mxu1 %v1504_v49  ;;  %933 = vmatpush1.bf16.msra.mxu0 %v1507_v53 }
 0x135   :  { %882 = vmatprep.subr.bf16.mxu1 %v1512_v39  ;;  %934 = vmatprep.subr.bf16.mxu0 %v1515_v54 }
 0x138   :  { %883 = vmatpush1.bf16.msra.mxu1 %v1510_v50  ;;  %935 = vmatpush1.bf16.msra.mxu0 %v1513_v44 }
 0x139   :  { %884 = vmatprep.subr.bf16.mxu1 %v1518_v56  ;;  %936 = vmatprep.subr.bf16.mxu0 %v1521_v33 }
 0x13c   :  { %885 = vmatpush1.bf16.msra.mxu1 %v1516_v59  ;;  %937 = vmatpush1.bf16.msra.mxu0 %v1519_v60 }
 0x13d   :  { %1447 = vmatprep.subr.bf16.mxu0 %v1597_v25  ;;  %1427 = vmatprep.subr.bf16.mxu1 %v1522_v46 }
 0x1ee   :  { %v1413_v55 = vpop.f32.mrf.mxu1  ;;  %v1425_v62 = vpop.f32.mrf.mxu0 }
 0x1ef   :  { %v711_v11 = vmax.f32 %v1413_v55, %v1425_v62 }
 0x1f0   :  { %v639_v63 = vpop.f32.mrf.mxu1  ;;  %v694_v1 = vpop.f32.mrf.mxu0 }
 0x1f1   :  { %v709_v6 = vmax.f32 %v639_v63, %v694_v1 }
 0x1f2   :  { %v1414_v2 = vpop.f32.mrf.mxu1  ;;  %v1426_v5 = vpop.f32.mrf.mxu0 }
 0x1f3   :  { %v712_v8 = vmax.f32 %v1414_v2, %v1426_v5 }
 0x1f4   :  { %v642_v35 = vpop.f32.mrf.mxu1  ;;  %v697_v61 = vpop.f32.mrf.mxu0 }
 0x1f5   :  { %v710_v43 = vmax.f32 %v642_v35, %v697_v61  ;;  %v1475_v13 = vpack.i.bf16 %v712_v8, %v711_v11  ;;  %v1094_v61 = vsub.s32 1, %v1664_v16 }
 0x1f7   :  { %v1470_v10 = vpack.i.bf16 %v710_v43, %v709_v6 }
 0x1f9   :  { %1471 = vrot.lane.b32.xlu0 %v1470_v10, %s1598_s3 }
 0x1fd   :  { %1476 = vrot.lane.b32.xlu0 %v1475_v13, %s1598_s3 }
 0x26b   :  { %v1472_v52 = vpop.permute.xlu0 %1471 }
 0x26c   :  { %v1474_v9 = vunpack.i.h.bf16 %v1472_v52  ;;  %v1473_v14 = vunpack.i.l.bf16 %v1472_v52 }
 0x26e   :  { %v730_v51 = vmax.f32 %v710_v43, %v1474_v9  ;;  %v729_v19 = vmax.f32 %v709_v6, %v1473_v14  ;;  %v1106_v6 = vsel %vm1104_vm1, 4, %v1596_v0 }
 0x26f   :  { %v1477_v57 = vpop.permute.xlu0 %1476 }
 0x270   :  { %v733_v23 = vpack.c.bf16 %v730_v51, %v729_v19  ;;  %v1479_v12 = vunpack.i.h.bf16 %v1477_v57  ;;  %v1478_v58 = vunpack.i.l.bf16 %v1477_v57  ;;  %v1109_v19 = vadd.s32 4, %v556_v18 }
 0x272   :  { %1353 = vmatmul.mubr.msk.bf16.vlgmr.msra.gmra.mxu1 %vm863_vm15, %v733_v23  ;;  %1355 = vmatmul.mubr.msk.bf16.vlgmr.msra.gmra.mxu0 %vm863_vm15, %v733_v23  ;;  %v732_v30 = vmax.f32 %v712_v8, %v1479_v12  ;;  %v731_v32 = vmax.f32 %v711_v11, %v1478_v58  ;;  %vm1111_vm3 = vcmp.eq.s32.totalorder %v1672_v20, %v1109_v19 }
 0x273   :  { %1428 = vmatpush3.bf16.msra.mxu1 %v1522_v46  ;;  %912 = vmatprep.mubr.bf16.mxu1 %v1596_v0 }
 0x274   :  { %1429 = vmatprep.subr.bf16.mxu1 %v1523_v24  ;;  %964 = vmatprep.mubr.bf16.mxu0 %v1596_v0  ;;  %v734_v27 = vpack.c.bf16 %v732_v30, %v731_v32  ;;  %v1095_v30 = vrot.slane %v1727_v3, %v1094_v61  ;;  %v1108_v32 = vadd.s32 %v1106_v6, %v1675_v21  ;;  %v1227_v61 = vrot.slane %v1727_v3, 3 }
 0x276   :  { %vm1110_vm2 = vcmp.eq.s32.totalorder %v1672_v20, %v1108_v32 }
 0x277   :  { %1430 = vmatpush3.bf16.msra.mxu1 %v1523_v24 }
 0x278   :  { %1431 = vmatprep.subr.bf16.mxu1 %v1524_v4 }
 0x27a   :  { %1354 = vmatmul.mubr.msk.bf16.gmra.mxu1 %vm863_vm15, %v734_v27  ;;  %1356 = vmatmul.mubr.msk.bf16.gmra.mxu0 %vm863_vm15, %v734_v27 }
 0x27b   :  { %1432 = vmatpush3.bf16.msra.mxu1 %v1524_v4  ;;  %1435 = vmatprep.mubr.msk.bf16.mxu1 %vm863_vm15, %v733_v23 }
 0x27c   :  { %1433 = vmatprep.subr.bf16.mxu1 %v1525_v47  ;;  %1451 = vmatprep.mubr.msk.bf16.mxu0 %vm1599_vm0, %v1597_v25 }
 0x27f   :  { %1434 = vmatpush3.bf16.msra.mxu1 %v1525_v47 }
 0x280   :  { %1439 = vmatprep.subr.bf16.mxu1 %v1597_v25 }
 0x282   :  { %1436 = vmatmul.mubr.msk.bf16.vlgmr.msra.gmra.mxu1 %vm863_vm15, %v734_v27 }
 0x283   :  { %1443 = vmatprep.mubr.msk.bf16.mxu1 %vm1599_vm0, %v1597_v25 }
 0x332   :  { %v904_v34 = vpop.f32.mrf.mxu1  ;;  %v956_v28 = vpop.f32.mrf.mxu0 }
 0x333   :  { %v1045_v63 = vrot.slane %v956_v28, 2 }
 0x334   :  { %v906_v29 = vpop.f32.mrf.mxu1  ;;  %v958_v22 = vpop.f32.mrf.mxu0 }
 0x335   :  { %v1028_v45 = vrot.slane %v906_v29, 1  ;;  %v1062_v13 = vrot.slane %v958_v22, 3  ;;  %v1116_v29 = vadd.s32 1, %v1109_v19 }
 0x336   :  { %v908_v15 = vpop.f32.mrf.mxu1  ;;  %v960_v36 = vpop.f32.mrf.mxu0 }
 0x337   :  { %v1046_v44 = vrot.slane %v960_v36, 2  ;;  %vm1118_vm5 = vcmp.eq.s32.totalorder %v1672_v20, %v1116_v29 }
 0x338   :  { %v910_v26 = vpop.f32.mrf.mxu1  ;;  %v962_v37 = vpop.f32.mrf.mxu0 }
 0x339   :  { %v1029_v40 = vrot.slane %v910_v26, 1  ;;  %v1063_v2 = vrot.slane %v962_v37, 3  ;;  %v1047_v43 = vsel %vm412_vm8, %v1045_v63, %v1046_v44 }
 0x33a   :  { %v914_v7 = vpop.f32.mrf.mxu1  ;;  %v966_v38 = vpop.f32.mrf.mxu0 }
 0x33b   :  { %v1030_v53 = vsel %vm372_vm7, %v1028_v45, %v1029_v40  ;;  %v1048_v56 = vrot.slane %v966_v38, 2  ;;  %v1064_v0 = vsel %vm452_vm9, %v1062_v13, %v1063_v2 }
 0x33c   :  { %v916_v41 = vpop.f32.mrf.mxu1  ;;  %v968_v31 = vpop.f32.mrf.mxu0  ;;  %v1038_v60 = vadd.f32 %v1030_v53, %v904_v34 }
 0x33d   :  { %v1031_v42 = vrot.slane %v916_v41, 1  ;;  %v1049_v8 = vsel %vm412_vm8, %v1046_v44, %v1048_v56  ;;  %v1065_v10 = vrot.slane %v968_v31, 3 }
 0x33e   :  { %v918_v48 = vpop.f32.mrf.mxu1  ;;  %v970_v49 = vpop.f32.mrf.mxu0  ;;  %v1055_v52 = vadd.f32 %v1047_v43, %v1038_v60 }
 0x33f   :  { %v1032_v39 = vsel %vm372_vm7, %v1029_v40, %v1031_v42  ;;  %v1050_v33 = vrot.slane %v970_v49, 2  ;;  %v1066_v4 = vsel %vm452_vm9, %v1063_v2, %v1065_v10  ;;  %v1112_v48 = vsel %vm1110_vm2, 1.0, %v1597_v25 }
 0x340   :  { %v919_v54 = vpop.f32.mrf.mxu1  ;;  %v972_v50 = vpop.f32.mrf.mxu0  ;;  %v1039_v55 = vadd.f32 %v1032_v39, %v908_v15  ;;  %v1072_v17 = vadd.f32 %v1064_v0, %v1055_v52  ;;  %v1113_v49 = vsel %vm1111_vm3, 1.0, %v1597_v25  ;;  %v1120_v39 = vsel %vm1118_vm5, 1.0, %v1597_v25 }
 0x341   :  { %v1033_v59 = vrot.slane %v919_v54, 1  ;;  %v1067_v46 = vrot.slane %v972_v50, 3  ;;  %v1051_v11 = vsel %vm412_vm8, %v1048_v56, %v1050_v33  ;;  %v1114_v50 = vpack.c.bf16 %v1113_v49, %v1112_v48 }
 0x342   :  { %v1437_v62 = vpop.f32.mrf.mxu1  ;;  %v1056_v9 = vadd.f32 %v1049_v8, %v1039_v55  ;;  %v1242_v2 = vrot.slane %v1727_v3, 6  ;;  %vm1230_vm8 = vcmask 520192  }
 0x343   :  { %v1034_v1 = vsel %vm372_vm7, %v1031_v42, %v1033_v59  ;;  %v1068_v57 = vsel %vm452_vm9, %v1065_v10, %v1067_v46  ;;  %v1082_v23 = vrot.slane %v1437_v62, 4  ;;  %vm1246_vm7 = vcmask 523269  }
 0x344   :  { %v1040_v5 = vadd.f32 %v1034_v1, %v914_v7  ;;  %v1009_v35 = vpop.f32.mrf.mxu1  ;;  %v1073_v18 = vadd.f32 %v1066_v4, %v1056_v9  ;;  %v1115_v7 = vadd.s32 1, %v1108_v32 }
 0x345   :  { %v1079_v27 = vrot.slane %v1009_v35, 4 }
 0x346   :  { %v1057_v14 = vadd.f32 %v1051_v11, %v1040_v5  ;;  %v1438_v51 = vpop.f32.mrf.mxu1  ;;  %vm1117_vm4 = vcmp.eq.s32.totalorder %v1672_v20, %v1115_v7 }
 0x347   :  { %v1084_v12 = vrot.slane %v1438_v51, 4  ;;  %v1119_v53 = vsel %vm1117_vm4, 1.0, %v1597_v25 }
 0x348   :  { %v1074_v58 = vadd.f32 %v1068_v57, %v1057_v14  ;;  %v1012_v24 = vpop.f32.mrf.mxu1  ;;  %v1121_v44 = vpack.c.bf16 %v1120_v39, %v1119_v53 }
 0x349   :  { %v1085_v47 = vsel %vm492_vm10, %v1082_v23, %v1084_v12  ;;  %v1080_v34 = vrot.slane %v1012_v24, 4 }
 0x34a   :  { %v1091_v28 = vadd.f32 %v1085_v47, %v1074_v58 }
 0x34b   :  { %v1081_v22 = vsel %vm492_vm10, %v1079_v27, %v1080_v34  ;;  %v1083_v15 = vsel %vm492_vm10, %v1080_v34, %v1082_v23 }
 0x34c   :  { %v1089_v36 = vadd.f32 %v1081_v22, %v1072_v17  ;;  %v1090_v26 = vadd.f32 %v1083_v15, %v1073_v18  ;;  %v1098_v37 = vadd.f32 %v1095_v30, %v1091_v28 }
 0x34e   :  { %v1096_v38 = vadd.f32 %v1095_v30, %v1089_v36  ;;  %v1097_v21 = vadd.f32 %v1095_v30, %v1090_v26  ;;  %v1101_v40 = vmax.f32 %v1098_v37, 0.0 }
 0x350   :  { %v1103_v41 = vpack.c.bf16 %v1101_v40, %v1101_v40  ;;  %v1099_v31 = vmax.f32 %v1096_v38, 0.0  ;;  %v1100_v45 = vmax.f32 %v1097_v21, 0.0 }
 0x352   :  { %v1127_v42 = vsel %vm492_vm10, %v1103_v41, 0  ;;  %v1102_v54 = vpack.c.bf16 %v1100_v45, %v1099_v31  ;;  %vm1250_vm10 = vcmask 517120  }
 0x353   :  { %1440 = vmatpush3.bf16.msra.mxu1 %v1127_v42  ;;  %1448 = vmatpush3.bf16.msra.mxu0 %v1127_v42 }
 0x354   :  { %1441 = vmatprep.subr.bf16.mxu1 %v1597_v25  ;;  %1449 = vmatprep.subr.bf16.mxu0 %v1597_v25 }
 0x357   :  { %1442 = vmatpush3.bf16.msra.mxu1 %v1102_v54  ;;  %1450 = vmatpush3.bf16.msra.mxu0 %v1102_v54 }
 0x35a   :  { %1444 = vmatmul.mubr.msk.bf16.vlgmr.msra.gmra.mxu1 %vm1122_vm6, %v1114_v50  ;;  %1452 = vmatmul.mubr.msk.bf16.vlgmr.msra.gmra.mxu0 %vm1122_vm6, %v1121_v44 }
 0x41a   :  { %v1163_v56 = vpop.f32.mrf.mxu1  ;;  %v1207_v33 = vpop.f32.mrf.mxu0 }
 0x41b   :  { %v1214_v59 = vmax.f32 %v1163_v56, %v1207_v33 }
 0x41c   :  { %v1445_v60 = vpop.f32.mrf.mxu1  ;;  %v1453_v55 = vpop.f32.mrf.mxu0 }
 0x41d   :  { %1218 = vrot.lane.b32.xlu1 %v1214_v59, %s1598_s3 }
 0x41e   :  { %v1166_v62 = vpop.f32.mrf.mxu1  ;;  %v1210_v63 = vpop.f32.mrf.mxu0 }
 0x41f   :  { %v1215_v1 = vmax.f32 %v1166_v62, %v1210_v63 }
 0x420   :  { %v1446_v46 = vpop.f32.mrf.mxu1  ;;  %v1454_v25 = vpop.f32.mrf.mxu0 }
 0x421   :  { %1220 = vrot.lane.b32.xlu1 %v1215_v1, %s1598_s3 }
 0x48f   :  { %v1219_v5 = vpop.permute.xlu1 %1218 }
 0x490   :  { %v1224_v35 = vmax.f32 %v1214_v59, %v1219_v5 }
 0x492   :  { %v1244_v6 = vmul.f32 %v1242_v2, %v1224_v35  ;;  %v1229_v11 = vmul.f32 %v1227_v61, %v1224_v35 }
 0x493   :  { %v1221_v43 = vpop.permute.xlu1 %1220 }
 0x494   :  { %v1225_v8 = vmax.f32 %v1215_v1, %v1221_v43  ;;  %v1247_v10 = vsel %vm1246_vm7, %v1244_v6, 0.0  ;;  %v1231_v52 = vsel %vm1230_vm8, %v1229_v11, 0.0 }
 0x495   :  { %1248 = vadd.xlane.f32.xlu0 %v1247_v10 }
 0x496   :  { %v1245_v13 = vmul.f32 %v1242_v2, %v1225_v8 }
 0x498   :  { %v1251_v9 = vsel %vm1250_vm10, %v1245_v13, 0.0 }
 0x499   :  { %1232 = vadd.xlane.f32.xlu0 %v1231_v52  ;;  %1252 = vadd.xlane.f32.xlu1 %v1251_v9 }
 0x51e   :  { %v1249_v14 = vpop.xlane.xlu0 %1248 }
 0x51f   :  { %v1257_v57 = vrot.slane %v1249_v14, 5 }
 0x522   :  { %v1233_v51 = vpop.xlane.xlu0 %1232  ;;  %v1253_v19 = vpop.xlane.xlu1 %1252 }
 0x523   :  { %v1234_v23 = vsel %vm452_vm9, %v1233_v51, 0.0  ;;  %v1258_v12 = vrot.slane %v1253_v19, 5 }
 0x524   :  { %v1235_v0 = vrot.slane %v1234_v23, 4 }
 0x525   :  { %v1259_v58 = vsel %vm1256_vm11, %v1257_v57, %v1258_v12 }
 0x526   :  { %v1236_v24 = vadd.f32 %v1235_v0, %v1234_v23  ;;  %v1261_v30 = vsel %vm452_vm9, %v1259_v58, 0.0  ;;  %vm1270_vm9 = vcmp.eq.s32.totalorder %v1672_v20, 0 }
 0x527   :  { %v1262_v32 = vrot.slane %v1261_v30, 4  ;;  %vm1273_vm14 = vmand %vm1272_vm12, %vm1270_vm9 }
 0x528   :  { %v1237_v4 = vrot.slane %v1236_v24, 2  ;;  %vm1271_vm15 = vmand %vm1269_vm13, %vm1270_vm9 }
 0x529   :  { %v1263_v27 = vadd.f32 %v1262_v32, %v1261_v30 }
 0x52a   :  { %v1238_v47 = vadd.f32 %v1237_v4, %v1236_v24 }
 0x52b   :  { %v1264_v34 = vrot.slane %v1263_v27, 2 }
 0x52c   :  { %v1239_v17 = vrot.slane %v1238_v47, 1 }
 0x52d   :  { %v1265_v18 = vadd.f32 %v1264_v34, %v1263_v27 }
 0x52e   :  { %v1240_v28 = vadd.f32 %v1239_v17, %v1238_v47 }
 0x52f   :  { %v1266_v29 = vrot.slane %v1265_v18, 1 }
 0x530   :  { %v1241_v15 = vadd.f32 %v1240_v28, %v1727_v3 }
 0x531   :  { %v1267_v22 = vadd.f32 %v1266_v29, %v1265_v18 }
 0x532   :  { %v1281_v37 = vrot.slane %v1241_v15, 2 }
 0x533   :  { %v1268_v36 = vadd.f32 %v1267_v22, %v1727_v3 }
 0x535   :  { %v1275_v26 = vrot.slane %v1268_v36, 2 }
 0x537   :  { %1457 = vpush %v1275_v26 }
 0x538   :  { %1459 = vpush %v1281_v37 }
 0x568   :  { %s1458_s10 = spop %1457 }
 0x569   :  { %v1277_v7 = vstv %s1458_s10  ;;  %s1460_s11 = spop %1459 }
 0x56a   :  { %v1279_v38 = vsel %vm1273_vm14, %v1277_v7, 0.0  ;;  %v1283_v21 = vstv %s1460_s11 }
 0x56b   :  { %v1285_v3 = vsel %vm1271_vm15, %v1283_v21, %v1279_v38 }
 0x56c   :  { %1286 = vst [vmem:[#allocation7] sm:$0xff] %v1285_v3 }
 0x56d   :  { %1577 = shalt.err (!%p1574_p0)
}
 0x56e   :  { %1296 = dma.vmem_to_hbm [thread:$0]  %s1294_s9, 128, %s1877_s4, [#allocation4]  }
 0x56f   :  { %1590 = dma.done.wait [#allocation4], 128  }
 0x570   :  { %1591 = vsyncadd [#allocation4], 4294967168 }
 0x571   :  { %1300 = vsyncpa [#allocation3], 1 }
 0x572   :  { %1301 = vsyncpa [#allocation6], 1 }
 0x573   :  { %1302 = vsyncpa [#allocation4], 1 }

</bundles_post_ra>
